<compile_context>
chip_gen: v7x
topology: tpu7x:2x2x1
jax: 0.10.0
libtpu: 0.0.40
codegen_flags: <defaults>
</compile_context>

<pallas_src>
import functools
import math

import jax
import jax.numpy as jnp
from jax import lax
from jax.experimental import pallas as pl
from jax.experimental.pallas import tpu as pltpu


def _ru(x, m):
    return (x + m - 1) // m * m


def _cdiv(a, b):
    return -(-a // b)


def _pick_tile(n, cands):
    for c in cands:
        if n % c == 0:
            return c
    return None


@functools.lru_cache(maxsize=None)
def _vmem_budget_bytes():
    """Generation-aware VMEM budget (~48 MiB on v7x, ~96 MiB on v5e/v6e)."""
    cap = 64 * 1024 * 1024
    try:
        info = pltpu.get_tpu_info()
        cap = int(getattr(info, 'vmem_capacity_bytes', cap))
    except Exception:
        pass
    budget = int(cap * 3 // 4)
    return max(32 * 1024 * 1024, min(budget, 100 * 1024 * 1024))


# ---------------------------------------------------------------------------
# Pallas kernel 1: tiled matmul + fused shift (+residual) (+ReLU) epilogue.
# Used for every 1x1 convolution and the im2col fallback convolutions.
# ---------------------------------------------------------------------------
def _mm_kernel(a_ref, b_ref, shift_ref, *rest, relu, has_res):
    if has_res:
        res_ref, o_ref, acc_ref = rest
    else:
        o_ref, acc_ref = rest

    @pl.when(pl.program_id(2) == 0)
    def _():
        acc_ref[...] = jnp.zeros_like(acc_ref)

    acc_ref[...] += jnp.dot(a_ref[...], b_ref[...],
                            preferred_element_type=jnp.float32)

    @pl.when(pl.program_id(2) == pl.num_programs(2) - 1)
    def _():
        y = acc_ref[...] + shift_ref[...]
        if has_res:
            y = y + res_ref[...].astype(jnp.float32)
        if relu:
            y = jnp.maximum(y, 0.0)
        o_ref[...] = y.astype(o_ref.dtype)


@functools.lru_cache(maxsize=None)
def _build_mm(M, K, N, tm, tk, tn, relu, has_res, out_dtype_name):
    out_dtype = jnp.dtype(out_dtype_name)
    grid = (M // tm, N // tn, K // tk)
    in_specs = [
        pl.BlockSpec((tm, tk), lambda i, j, k: (i, k)),
        pl.BlockSpec((tk, tn), lambda i, j, k: (k, j)),
        pl.BlockSpec((1, tn), lambda i, j, k: (0, j)),
    ]
    if has_res:
        in_specs.append(pl.BlockSpec((tm, tn), lambda i, j, k: (i, j)))
    flops = 2 * M * K * N
    bytes_acc = int((M * K + K * N) * 2 + M * N * (2 + (2 if has_res else 0)))
    f = pl.pallas_call(
        functools.partial(_mm_kernel, relu=relu, has_res=has_res),
        out_shape=jax.ShapeDtypeStruct((M, N), out_dtype),
        grid_spec=pltpu.PrefetchScalarGridSpec(
            num_scalar_prefetch=0,
            grid=grid,
            in_specs=in_specs,
            out_specs=pl.BlockSpec((tm, tn), lambda i, j, k: (i, j)),
            scratch_shapes=[pltpu.VMEM((tm, tn), jnp.float32)]),
        compiler_params=pltpu.CompilerParams(
            dimension_semantics=("parallel", "parallel", "arbitrary"),
            vmem_limit_bytes=_vmem_budget_bytes()),
        cost_estimate=pl.CostEstimate(flops=flops, transcendentals=0,
                                      bytes_accessed=bytes_acc),
    )
    return jax.jit(f)


def matmul_fused(a, b, shift, res=None, relu=False, out_dtype=jnp.bfloat16):
    """a:(M,K) @ b:(K,N) + shift(1,N) [+res(M,N)] [+ReLU], f32 accumulation."""
    M, K = a.shape
    _, N = b.shape
    tn = _pick_tile(N, (512, 256, 128)) or N
    tk = _pick_tile(K, (512, 256, 128)) or K
    tm = _pick_tile(M, (512, 256, 128, 64, 32, 16, 8))
    Mp = M
    if tm is None:                       # rare ragged-M fallback: pad + slice
        tm = min(128, _ru(M, 8))
        Mp = _ru(M, tm)
        a = jnp.pad(a, ((0, Mp - M), (0, 0)))
        if res is not None:
            res = jnp.pad(res, ((0, Mp - M), (0, 0)))
    # give both v7x TensorCores at least one block along the parallel axes
    if (Mp // tm) * (N // tn) < 2:
        for c in (tm // 2, tm // 4, tm // 8):
            if c >= 8 and Mp % c == 0:
                tm = c
                break
    f = _build_mm(Mp, K, N, tm, tk, tn, bool(relu), res is not None,
                  jnp.dtype(out_dtype).name)
    args = (a, b, shift) + ((res,) if res is not None else ())
    y = f(*args)
    return y if Mp == M else y[:M]


# ---------------------------------------------------------------------------
# Pallas kernel 2: fused NHWC spatial conv (stride 1, possibly dilated).
# The padded activation is flattened to (N, Hp*Wp, C); every tap (di, dj) is a
# single (h_chunk*Wp, tk) @ (tk, tn) MXU dot against a flat-shifted slab, so
# there is exactly one input slab in VMEM per (batch, Cout-tile, Cin-tile)
# grid step and no halo/ per-row dots.  BN shift + ReLU fused in the epilogue.
# ---------------------------------------------------------------------------
def _conv_tap_kernel(x_ref, w_ref, shift_ref, o_ref, acc_ref, *,
                     kh, kw, dil, wp, h_step, n_chunks, relu):
    k = pl.program_id(2)

    @pl.when(k == 0)
    def _():
        acc_ref[...] = jnp.zeros_like(acc_ref)

    m = h_step * wp
    for c in range(n_chunks):
        r0 = c * h_step
        for di in range(kh):
            for dj in range(kw):
                start = (r0 + di * dil) * wp + dj * dil
                a = x_ref[0, start: start + m, :]            # (m, tk) bf16
                acc_ref[r0 * wp: r0 * wp + m, :] += jnp.dot(
                    a, w_ref[di * kw + dj],
                    preferred_element_type=jnp.float32)

    @pl.when(k == pl.num_programs(2) - 1)
    def _():
        y = acc_ref[...] + shift_ref[...]
        if relu:
            y = jnp.maximum(y, 0.0)
        o_ref[0] = y.astype(o_ref.dtype)


@functools.lru_cache(maxsize=None)
def _build_conv_fused(N, Lp, Cin, Cout, kh, kw, dil, wp, ho, h_step,
                      tk, tn, relu, out_dtype_name):
    out_dtype = jnp.dtype(out_dtype_name)
    n_chunks = ho // h_step
    grid = (N, Cout // tn, Cin // tk)
    in_specs = [
        pl.BlockSpec((1, Lp, tk), lambda n, j, k: (n, 0, k)),
        pl.BlockSpec((kh * kw, tk, tn), lambda n, j, k: (0, k, j)),
        pl.BlockSpec((1, tn), lambda n, j, k: (0, j)),
    ]
    M = ho * wp
    f = pl.pallas_call(
        functools.partial(_conv_tap_kernel, kh=kh, kw=kw, dil=dil, wp=wp,
                          h_step=h_step, n_chunks=n_chunks, relu=relu),
        out_shape=jax.ShapeDtypeStruct((N, M, Cout), out_dtype),
        grid_spec=pltpu.PrefetchScalarGridSpec(
            num_scalar_prefetch=0,
            grid=grid,
            in_specs=in_specs,
            out_specs=pl.BlockSpec((1, M, tn), lambda n, j, k: (n, 0, j)),
            scratch_shapes=[pltpu.VMEM((M, tn), jnp.float32)]),
        compiler_params=pltpu.CompilerParams(
            dimension_semantics=("parallel", "parallel", "arbitrary"),
            vmem_limit_bytes=_vmem_budget_bytes()),
        cost_estimate=pl.CostEstimate(
            flops=int(2 * N * M * Cin * Cout * kh * kw),
            transcendentals=0,
            bytes_accessed=int(N * Lp * Cin * 2 * (Cout // tn)
                               + N * kh * kw * Cin * Cout * 2
                               + N * M * Cout * 2)),
    )
    return jax.jit(f)


def conv_spatial_fused(x, wd, relu, out_dtype=jnp.bfloat16):
    """Stride-1 kh x kw (possibly dilated) conv over NHWC, BN-shift+ReLU fused."""
    N, H, W, C = x.shape
    kh, kw = wd['khkw']
    d, pad = wd['dilation'], wd['padding']
    Cout = wd['wt'].shape[-1]
    Ho = H + 2 * pad - d * (kh - 1)
    Wo = W + 2 * pad - d * (kw - 1)
    Hp = H + 2 * pad
    Wp = W + 2 * pad
    extra_rows = _cdiv((kw - 1) * d, Wp) if kw > 1 else 0   # keep last tap in-bounds
    Lp = (Hp + extra_rows) * Wp

    tk = _pick_tile(C, (512, 256, 128)) or C
    tn = _pick_tile(Cout, (512, 256, 128)) or Cout

    # per-dot row count (MXU push size); divide Ho into chunks inside the kernel
    m_cap = 2048
    if Ho * Wp <= m_cap:
        h_step = Ho
    else:
        h_step = max(1, m_cap // Wp)
        while Ho % h_step:
            h_step -= 1

    # keep the per-step working set within a generation-aware VMEM budget
    budget = int(_vmem_budget_bytes() * 0.6)

    def _est(tk_, tn_):
        return (Lp * tk_ * 2 * 2 + kh * kw * tk_ * tn_ * 2 * 2
                + Ho * Wp * tn_ * (2 * 2 + 4) + tn_ * 16)

    while _est(tk, tn) > budget and tk > 128 and C % (tk // 2) == 0:
        tk //= 2
    while _est(tk, tn) > budget and tn > 128 and Cout % (tn // 2) == 0:
        tn //= 2

    xp = jnp.pad(x, ((0, 0), (pad, pad + extra_rows), (pad, pad), (0, 0)))
    xp = xp.reshape(N, Lp, C)

    f = _build_conv_fused(N, Lp, C, Cout, kh, kw, d, Wp, Ho, h_step,
                          tk, tn, bool(relu), jnp.dtype(out_dtype).name)
    y = f(xp, wd['wt'], wd['shift'])                     # (N, Ho*Wp, Cout)
    y = y.reshape(N, Ho, Wp, Cout)
    return y[:, :, :Wo, :] if Wp != Wo else y


# ---------------------------------------------------------------------------
# Pallas kernel 3: ASPP projection (1280 -> 256) without materializing the
# five-way channel concat: four 256x256 chunk matmuls reduced in one call;
# the image-pooling branch contribution arrives as a (spatially constant)
# residual; BN shift + ReLU fused.
# ---------------------------------------------------------------------------
def _aspp_proj_kernel(b0, b1, b2, b3, w_ref, shift_ref, res_ref, o_ref):
    acc = jnp.dot(b0[...], w_ref[0], preferred_element_type=jnp.float32)
    acc = acc + jnp.dot(b1[...], w_ref[1], preferred_element_type=jnp.float32)
    acc = acc + jnp.dot(b2[...], w_ref[2], preferred_element_type=jnp.float32)
    acc = acc + jnp.dot(b3[...], w_ref[3], preferred_element_type=jnp.float32)
    y = acc + shift_ref[...] + res_ref[...].astype(jnp.float32)
    o_ref[...] = jnp.maximum(y, 0.0).astype(o_ref.dtype)


@functools.lru_cache(maxsize=None)
def _build_aspp_proj(M, tm, C, out_dtype_name):
    out_dtype = jnp.dtype(out_dtype_name)
    bspec = pl.BlockSpec((tm, C), lambda i: (i, 0))
    f = pl.pallas_call(
        _aspp_proj_kernel,
        out_shape=jax.ShapeDtypeStruct((M, C), out_dtype),
        grid_spec=pltpu.PrefetchScalarGridSpec(
            num_scalar_prefetch=0,
            grid=(M // tm,),
            in_specs=[bspec, bspec, bspec, bspec,
                      pl.BlockSpec((4, C, C), lambda i: (0, 0, 0)),
                      pl.BlockSpec((1, C), lambda i: (0, 0)),
                      pl.BlockSpec((tm, C), lambda i: (i, 0))],
            out_specs=pl.BlockSpec((tm, C), lambda i: (i, 0))),
        compiler_params=pltpu.CompilerParams(
            dimension_semantics=("parallel",),
            vmem_limit_bytes=_vmem_budget_bytes()),
        cost_estimate=pl.CostEstimate(flops=int(2 * M * C * C * 4),
                                      transcendentals=0,
                                      bytes_accessed=int(M * C * 2 * 6
                                                         + 4 * C * C * 2)),
    )
    return jax.jit(f)


def aspp_project(branches, w_stacked, shift, res, out_dtype=jnp.bfloat16):
    M, C = branches[0].shape
    tm = _pick_tile(M, (512, 256, 128, 64, 32, 16, 8))
    Mp = M
    if tm is None:
        tm = min(128, _ru(M, 8))
        Mp = _ru(M, tm)
        branches = [jnp.pad(b, ((0, Mp - M), (0, 0))) for b in branches]
        res = jnp.pad(res, ((0, Mp - M), (0, 0)))
    elif (Mp // tm) < 2:
        for c in (tm // 2, tm // 4):
            if c >= 8 and Mp % c == 0:
                tm = c
                break
    f = _build_aspp_proj(Mp, tm, C, jnp.dtype(out_dtype).name)
    y = f(*branches, w_stacked, shift, res)
    return y if Mp == M else y[:M]


# ---------------------------------------------------------------------------
# NHWC im2col fallback (channel-concat, no transposes) for strided convs.
# ---------------------------------------------------------------------------
def _im2col_nhwc(x, kh, kw, stride, padding, dilation):
    N, H, W, C = x.shape
    Ho = (H + 2 * padding - dilation * (kh - 1) - 1) // stride + 1
    Wo = (W + 2 * padding - dilation * (kw - 1) - 1) // stride + 1
    xp = jnp.pad(x, ((0, 0), (padding, padding), (padding, padding), (0, 0)))
    cols = []
    for i in range(kh):
        for j in range(kw):
            cols.append(xp[:, i * dilation: i * dilation + (Ho - 1) * stride + 1: stride,
                              j * dilation: j * dilation + (Wo - 1) * stride + 1: stride, :])
    patches = jnp.concatenate(cols, axis=-1)          # (N, Ho, Wo, kh*kw*C)
    return patches.reshape(N * Ho * Wo, kh * kw * C), N, Ho, Wo


# ---------------------------------------------------------------------------
# Conv dispatch
# ---------------------------------------------------------------------------
def apply_conv(x, wd, relu=False, res=None, out_dtype=jnp.bfloat16):
    mode = wd['mode']
    if mode == 'mm':                                   # 1x1 conv
        s = wd['stride']
        if s > 1:
            x = x[:, ::s, ::s, :]
        N, H, W, C = x.shape
        a = x.reshape(N * H * W, C)
        r = None if res is None else res.reshape(N * H * W, -1)
        y = matmul_fused(a, wd['wm'], wd['shift'], res=r, relu=relu,
                         out_dtype=out_dtype)
        return y.reshape(N, H, W, -1)
    if mode == 'fused':                                # stride-1 spatial conv
        return conv_spatial_fused(x, wd, relu, out_dtype=out_dtype)
    # strided conv fallback (conv1 7x7 s2 and layer2.0.conv2 3x3 s2)
    kh, kw = wd['khkw']
    patches, N, Ho, Wo = _im2col_nhwc(x, kh, kw, wd['stride'], wd['padding'],
                                      wd['dilation'])
    y = matmul_fused(patches, wd['wm'], wd['shift'], relu=relu,
                     out_dtype=out_dtype)
    return y.reshape(N, Ho, Wo, -1)


def _maxpool_3x3_s2_p1(x):
    # MaxPool2d(kernel_size=3, stride=2, padding=1) on NHWC (JAX glue)
    return lax.reduce_window(x, jnp.array(-jnp.inf, x.dtype), lax.max,
                             (1, 3, 3, 1), (1, 2, 2, 1),
                             ((0, 0), (1, 1), (1, 1), (0, 0)))


# ---------------------------------------------------------------------------
# Deterministic parameter generation (synthetic, not pretrained)
# ---------------------------------------------------------------------------
class ParamGen:
    def __init__(self, seed=0):
        self.base = jax.random.PRNGKey(seed)
        self.i = 0

    def _k(self):
        k = jax.random.fold_in(self.base, self.i)
        self.i += 1
        return k

    def conv(self, shape):
        fan_in = shape[1] * shape[2] * shape[3]
        return (jax.random.normal(self._k(), shape, jnp.float32)
                * (1.0 / math.sqrt(max(fan_in, 1))))

    def bias(self, c):
        return 0.01 * jax.random.normal(self._k(), (c,), jnp.float32)

    def bn(self, c):
        return dict(
            gamma=1.0 + 0.05 * jax.random.normal(self._k(), (c,), jnp.float32),
            beta=0.05 * jax.random.normal(self._k(), (c,), jnp.float32),
            mean=0.05 * jax.random.normal(self._k(), (c,), jnp.float32),
            var=1.0 + 0.1 * jax.random.uniform(self._k(), (c,), jnp.float32),
        )


def _make_bottleneck(pg, inplanes, planes, stride, dilation, downsample):
    p = {
        'conv1_w': pg.conv((planes, inplanes, 1, 1)), 'bn1': pg.bn(planes),
        'conv2_w': pg.conv((planes, planes, 3, 3)), 'bn2': pg.bn(planes),
        'conv3_w': pg.conv((planes * 4, planes, 1, 1)), 'bn3': pg.bn(planes * 4),
        'stride': stride, 'dilation': dilation,
    }
    if downsample:
        p['down_w'] = pg.conv((planes * 4, inplanes, 1, 1))
        p['down_bn'] = pg.bn(planes * 4)
    return p


def _make_layer(pg, state, planes, blocks, stride, dilate):
    # Mirrors torchvision ResNet._make_layer (replace_stride_with_dilation).
    previous_dilation = state['dilation']
    if dilate:
        state['dilation'] *= stride
        stride = 1
    downsample = (stride != 1) or (state['inplanes'] != planes * 4)
    layers = [_make_bottleneck(pg, state['inplanes'], planes, stride,
                               previous_dilation, downsample)]
    state['inplanes'] = planes * 4
    for _ in range(1, blocks):
        layers.append(_make_bottleneck(pg, state['inplanes'], planes, 1,
                                       state['dilation'], False))
    return layers


def make_deeplabv3_params(pg):
    P = {}
    # ResNet-50 backbone (replace_stride_with_dilation=[False, True, True])
    P['conv1_w'] = pg.conv((64, 3, 7, 7))
    P['bn1'] = pg.bn(64)
    state = {'inplanes': 64, 'dilation': 1}
    P['layer1'] = _make_layer(pg, state, 64, 3, stride=1, dilate=False)
    P['layer2'] = _make_layer(pg, state, 128, 4, stride=2, dilate=False)
    P['layer3'] = _make_layer(pg, state, 256, 6, stride=2, dilate=True)
    P['layer4'] = _make_layer(pg, state, 512, 3, stride=2, dilate=True)
    # DeepLabHead(2048, 21): ASPP(2048, [12, 24, 36]) + 3x3 conv + classifier
    aspp = {}
    aspp['b0_w'] = pg.conv((256, 2048, 1, 1)); aspp['b0_bn'] = pg.bn(256)
    for i, rate in zip((1, 2, 3), (12, 24, 36)):
        aspp[f'b{i}_w'] = pg.conv((256, 2048, 3, 3))
        aspp[f'b{i}_bn'] = pg.bn(256)
        aspp[f'b{i}_rate'] = rate
    aspp['pool_w'] = pg.conv((256, 2048, 1, 1)); aspp['pool_bn'] = pg.bn(256)
    aspp['proj_w'] = pg.conv((256, 1280, 1, 1)); aspp['proj_bn'] = pg.bn(256)
    P['aspp'] = aspp
    P['head_conv_w'] = pg.conv((256, 256, 3, 3)); P['head_conv_bn'] = pg.bn(256)
    P['head_cls_w'] = pg.conv((21, 256, 1, 1)); P['head_cls_b'] = pg.bias(21)
    # Trailing nn.Conv2d(21, 2, kernel_size=(1, 1)) from the DeepLabV3 wrapper
    P['final_w'] = pg.conv((2, 21, 1, 1)); P['final_b'] = pg.bias(2)
    return P


# ---------------------------------------------------------------------------
# Parameter preparation: fold eval-mode BN into weights, pre-transpose to the
# kernel layouts, cast to bf16 (shift stays f32).
# ---------------------------------------------------------------------------
def _prep_conv(w, bn=None, bias=None, stride=1, padding=0, dilation=1):
    Cout, Cin, kh, kw = w.shape
    if bn is not None:
        scale = bn['gamma'] / jnp.sqrt(bn['var'] + 1e-5)
        shift = bn['beta'] - bn['mean'] * scale
    else:
        scale = jnp.ones((Cout,), jnp.float32)
        shift = bias if bias is not None else jnp.zeros((Cout,), jnp.float32)
    wf = w * scale[:, None, None, None]
    d = {'shift': shift.reshape(1, Cout).astype(jnp.float32),
         'stride': stride, 'padding': padding, 'dilation': dilation,
         'khkw': (kh, kw)}
    if kh == 1 and kw == 1:
        d['mode'] = 'mm'
        d['wm'] = wf[:, :, 0, 0].T.astype(jnp.bfloat16)              # (Cin, Cout)
    elif stride == 1:
        d['mode'] = 'fused'
        d['wt'] = wf.transpose(2, 3, 1, 0).reshape(kh * kw, Cin, Cout) \
                    .astype(jnp.bfloat16)                            # (taps, Cin, Cout)
    else:
        d['mode'] = 'im2col'
        d['wm'] = wf.transpose(2, 3, 1, 0).reshape(kh * kw * Cin, Cout) \
                    .astype(jnp.bfloat16)                            # (taps*Cin, Cout)
    return d


def _prep_block(b):
    p = {'c1': _prep_conv(b['conv1_w'], bn=b['bn1']),
         'c2': _prep_conv(b['conv2_w'], bn=b['bn2'], stride=b['stride'],
                          padding=b['dilation'], dilation=b['dilation']),
         'c3': _prep_conv(b['conv3_w'], bn=b['bn3'])}
    if 'down_w' in b:
        p['down'] = _prep_conv(b['down_w'], bn=b['down_bn'], stride=b['stride'])
    return p


def prepare_params(raw):
    P = {'conv1': _prep_conv(raw['conv1_w'], bn=raw['bn1'], stride=2, padding=3)}
    for name in ('layer1', 'layer2', 'layer3', 'layer4'):
        P[name] = [_prep_block(b) for b in raw[name]]
    a = raw['aspp']
    A = {'b0': _prep_conv(a['b0_w'], bn=a['b0_bn'])}
    for i in (1, 2, 3):
        r = a[f'b{i}_rate']
        A[f'b{i}'] = _prep_conv(a[f'b{i}_w'], bn=a[f'b{i}_bn'],
                                padding=r, dilation=r)
    A['pool'] = _prep_conv(a['pool_w'], bn=a['pool_bn'])
    # ASPP projection (1280 -> 256) split into per-branch 256x256 chunks so the
    # five-way concat is never materialized; the image-pooling branch's
    # (spatially constant) contribution is applied as a residual term.
    bnp = a['proj_bn']
    scale = bnp['gamma'] / jnp.sqrt(bnp['var'] + 1e-5)
    shift = bnp['beta'] - bnp['mean'] * scale
    wm = (a['proj_w'] * scale[:, None, None, None])[:, :, 0, 0].T    # (1280, 256)
    A['proj_chunks'] = wm[:1024].reshape(4, 256, 256).astype(jnp.bfloat16)
    A['proj_pool'] = wm[1024:]                                       # (256, 256) f32
    A['proj_shift'] = shift.reshape(1, 256).astype(jnp.float32)
    P['aspp'] = A
    P['head_conv'] = _prep_conv(raw['head_conv_w'], bn=raw['head_conv_bn'],
                                padding=1)
    # Classifier (256->21, bias) and the trailing Conv2d(21->2, bias) fused into
    # a single 256->2 matmul applied BEFORE the bilinear upsample: both are 1x1
    # convs and bilinear resize is channel-wise linear, so this is exact.
    w1 = raw['head_cls_w'][:, :, 0, 0].T        # (256, 21)
    w2 = raw['final_w'][:, :, 0, 0].T           # (21, 2)
    P['head_final'] = {
        'mode': 'mm', 'stride': 1, 'padding': 0, 'dilation': 1, 'khkw': (1, 1),
        'wm': jnp.dot(w1, w2).astype(jnp.bfloat16),
        'shift': (jnp.dot(raw['head_cls_b'], w2) + raw['final_b'])
                 .reshape(1, 2).astype(jnp.float32),
    }
    return P


# ---------------------------------------------------------------------------
# Forward pass (NHWC internally, bf16 activations)
# ---------------------------------------------------------------------------
def _bottleneck(x, p):
    out = apply_conv(x, p['c1'], relu=True)
    out = apply_conv(out, p['c2'], relu=True)
    if 'down' in p:
        identity = apply_conv(x, p['down'], relu=False)
    else:
        identity = x
    # residual add + ReLU fused into the conv3 matmul epilogue
    return apply_conv(out, p['c3'], relu=True, res=identity)


def deeplabv3_forward(P, x_nchw):
    Hin, Win = x_nchw.shape[2], x_nchw.shape[3]
    x = jnp.transpose(x_nchw, (0, 2, 3, 1)).astype(jnp.bfloat16)   # NHWC once
    # backbone
    x = apply_conv(x, P['conv1'], relu=True)
    x = _maxpool_3x3_s2_p1(x)
    for name in ('layer1', 'layer2', 'layer3', 'layer4'):
        for bp in P[name]:
            x = _bottleneck(x, bp)
    # ASPP
    a = P['aspp']
    b0 = apply_conv(x, a['b0'], relu=True)
    b1 = apply_conv(x, a['b1'], relu=True)
    b2 = apply_conv(x, a['b2'], relu=True)
    b3 = apply_conv(x, a['b3'], relu=True)
    # image-pooling branch: tiny matmuls -> plain jnp.dot (not worth a kernel)
    gp = jnp.mean(x.astype(jnp.float32), axis=(1, 2))              # (N, 2048)
    pw = a['pool']
    gp = jnp.maximum(jnp.dot(gp, pw['wm'].astype(jnp.float32)) + pw['shift'],
                     0.0)                                          # (N, 256)
    pool_res = jnp.dot(gp, a['proj_pool'])                         # (N, 256)
    N, h, w, _ = b0.shape
    M = N * h * w
    res = jnp.broadcast_to(pool_res[:, None, :], (N, h * w, 256)) \
             .reshape(M, 256).astype(jnp.bfloat16)
    y = aspp_project([f.reshape(M, 256) for f in (b0, b1, b2, b3)],
                     a['proj_chunks'], a['proj_shift'], res)
    y = y.reshape(N, h, w, 256)
    # (ASPP Dropout(0.5) -> identity at inference)
    y = apply_conv(y, P['head_conv'], relu=True)
    # fused (head_cls . final): 256 -> 2, applied before the upsample
    y = apply_conv(y, P['head_final'], relu=False, out_dtype=jnp.float32)
    # F.interpolate(..., mode='bilinear', align_corners=False)  (JAX glue)
    y = jax.image.resize(y, (N, Hin, Win, y.shape[-1]), method='bilinear')
    return jnp.transpose(y, (0, 3, 1, 2))                          # back to NCHW


if __name__ == "__main__":
    pg = ParamGen(0)
    raw = make_deeplabv3_params(pg)
    params = prepare_params(raw)
    x = jax.random.normal(jax.random.PRNGKey(0), (2, 3, 32, 32), jnp.float32)
    y = deeplabv3_forward(params, x)
    y = jax.block_until_ready(y)
    assert y.shape == (2, 2, 32, 32), y.shape
    assert bool(jnp.all(jnp.isfinite(y)))
    print("KERNEL_OK")
</pallas_src>

<mosaic_0001>
module attributes {stable_mosaic.version = 11 : i64} {
  func.func @_mm_kernel(%arg0: i32, %arg1: i32, %arg2: i32, %arg3: memref<256x147xbf16, #tpu.memory_space<vmem>>, %arg4: memref<147x64xbf16, #tpu.memory_space<vmem>>, %arg5: memref<1x64xf32, #tpu.memory_space<vmem>>, %arg6: memref<256x64xbf16, #tpu.memory_space<vmem>>, %arg7: memref<256x64xf32, #tpu.memory_space<vmem>>) attributes {dimension_semantics = [#tpu.dimension_semantics<parallel>, #tpu.dimension_semantics<parallel>, #tpu.dimension_semantics<arbitrary>], iteration_bounds = array<i64: 2, 1, 1>, scalar_prefetch = 0 : i64, scratch_operands = 1 : i64, tpu.core_type = #tpu.core_type<tc>, window_params = [{transform_indices = @transform_0, window_bounds = array<i64: 256, 147>}, {transform_indices = @transform_1, window_bounds = array<i64: 147, 64>}, {transform_indices = @transform_2, window_bounds = array<i64: 1, 64>}, {transform_indices = @transform_3, window_bounds = array<i64: 256, 64>}]} {
    %c0_i32 = arith.constant 0 : i32
    %0 = arith.cmpi eq, %arg2, %c0_i32 : i32
    %1 = arith.extui %0 : i1 to i32
    %c0_i32_0 = arith.constant 0 : i32
    %2 = arith.cmpi ne, %1, %c0_i32_0 : i32
    scf.if %2 {
      %cst_10 = arith.constant 0.000000e+00 : f32
      %12 = vector.broadcast %cst_10 : f32 to vector<256x64xf32>
      %c0_11 = arith.constant 0 : index
      %c0_12 = arith.constant 0 : index
      %13 = vector.load %arg7[%c0_11, %c0_12] : memref<256x64xf32, #tpu.memory_space<vmem>>, vector<256x64xf32>
      tpu.vector_store %arg7[%c0_11, %c0_12], %12 {strides = array<i32>} : memref<256x64xf32, #tpu.memory_space<vmem>>, vector<256x64xf32>,
    } else {
    }
    %c0 = arith.constant 0 : index
    %c0_1 = arith.constant 0 : index
    %3 = vector.load %arg7[%c0, %c0_1] : memref<256x64xf32, #tpu.memory_space<vmem>>, vector<256x64xf32>
    %c0_2 = arith.constant 0 : index
    %c0_3 = arith.constant 0 : index
    %4 = vector.load %arg3[%c0_2, %c0_3] : memref<256x147xbf16, #tpu.memory_space<vmem>>, vector<256x147xbf16>
    %c0_4 = arith.constant 0 : index
    %c0_5 = arith.constant 0 : index
    %5 = vector.load %arg4[%c0_4, %c0_5] : memref<147x64xbf16, #tpu.memory_space<vmem>>, vector<147x64xbf16>
    %cst = arith.constant dense<0.000000e+00> : vector<256x64xf32>
    %6 = tpu.matmul %4, %5, %cst {dimension_numbers = #tpu.dot_dimension_numbers<[1], [0], [0], [1], [0, 0, 1, 1], [], []>} : vector<256x147xbf16>, vector<147x64xbf16>, vector<256x64xf32> -> vector<256x64xf32>
    %7 = arith.addf %3, %6 : vector<256x64xf32>
    %c0_6 = arith.constant 0 : index
    %c0_7 = arith.constant 0 : index
    %8 = vector.load %arg7[%c0_6, %c0_7] : memref<256x64xf32, #tpu.memory_space<vmem>>, vector<256x64xf32>
    tpu.vector_store %arg7[%c0_6, %c0_7], %7 {strides = array<i32>} : memref<256x64xf32, #tpu.memory_space<vmem>>, vector<256x64xf32>,
    %c0_i32_8 = arith.constant 0 : i32
    %9 = arith.cmpi eq, %arg2, %c0_i32_8 : i32
    %10 = arith.extui %9 : i1 to i32
    %c0_i32_9 = arith.constant 0 : i32
    %11 = arith.cmpi ne, %10, %c0_i32_9 : i32
    scf.if %11 {
      %c0_10 = arith.constant 0 : index
      %c0_11 = arith.constant 0 : index
      %12 = vector.load %arg7[%c0_10, %c0_11] : memref<256x64xf32, #tpu.memory_space<vmem>>, vector<256x64xf32>
      %c0_12 = arith.constant 0 : index
      %c0_13 = arith.constant 0 : index
      %13 = vector.load %arg5[%c0_12, %c0_13] : memref<1x64xf32, #tpu.memory_space<vmem>>, vector<1x64xf32>
      %14 = vector.broadcast %13 : vector<1x64xf32> to vector<256x64xf32>
      %15 = arith.addf %12, %14 : vector<256x64xf32>
      %cst_14 = arith.constant 0.000000e+00 : f32
      %16 = vector.broadcast %cst_14 : f32 to vector<256x64xf32>
      %17 = arith.maximumf %15, %16 : vector<256x64xf32>
      %18 = arith.truncf %17 : vector<256x64xf32> to vector<256x64xbf16>
      %c0_15 = arith.constant 0 : index
      %c0_16 = arith.constant 0 : index
      %19 = vector.load %arg6[%c0_15, %c0_16] : memref<256x64xbf16, #tpu.memory_space<vmem>>, vector<256x64xbf16>
      tpu.vector_store %arg6[%c0_15, %c0_16], %18 {strides = array<i32>} : memref<256x64xbf16, #tpu.memory_space<vmem>>, vector<256x64xbf16>,
    } else {
    }
    return
  }
  func.func @transform_0(%arg0: i32, %arg1: i32, %arg2: i32) -> (i32, i32) {
    %c0_i32 = arith.constant 0 : i32
    return %arg0, %arg2 : i32, i32
  }
  func.func @transform_1(%arg0: i32, %arg1: i32, %arg2: i32) -> (i32, i32) {
    %c0_i32 = arith.constant 0 : i32
    return %arg2, %arg1 : i32, i32
  }
  func.func @transform_2(%arg0: i32, %arg1: i32, %arg2: i32) -> (i32, i32) {
    %c0_i32 = arith.constant 0 : i32
    %c0_i32_0 = arith.constant 0 : i32
    return %c0_i32, %arg1 : i32, i32
  }
  func.func @transform_3(%arg0: i32, %arg1: i32, %arg2: i32) -> (i32, i32) {
    %c0_i32 = arith.constant 0 : i32
    return %arg0, %arg1 : i32, i32
  }
}

</mosaic_0001>

<bundles_post_ra>
// kernel: tpu_custom_call.1
= control target key start
LH: loop header
LB: loop body
LE: loop exit
PB: predicated region body
PF: predicated region fallthrough
CT: control target
= control target key end

     0   :  { %s1542_s12 = smov 0   ;;  %s1544_s13 = smov 0   ;;  %s1848_s0 = inlined_call_operand.vmem [shape: bf16[512,147], index: 0, kind: input, shape index: {}]   ;;  %s1849_s1 = inlined_call_operand.vmem [shape: bf16[147,64], index: 1, kind: input, shape index: {}]   ;;  %s1850_s2 = inlined_call_operand.vmem [shape: f32[1,64], index: 2, kind: input, shape index: {}]   ;;  %s1851_s3 = inlined_call_operand.vmem [shape: bf16[512,64], index: 3, kind: output, shape index: {}]  }
   0x1   :  { %s1546_s14 = smov 0  }
   0x2 LB: > { %s32_s15 = sadd.s32 1, %s1513_s13  ;;  %p1258_p0 = scmp.ge.s32.totalorder %s1517_s14, 1  ;;  %s1517_s14 = sphi %s1546_s14, %s13_s14   ;;  %s1513_s13 = sphi %s1544_s13, %s1853_s13   ;;  %s1509_s12 = sphi %s1542_s12, %s1852_s12  }
   0x3   : > { %p34_p1 = scmp.ge.s32.totalorder %s32_s15, 2  ;;  %p191_p2 = scmp.lt.s32.totalorder %s1517_s14, 3 }
   0x5   : > { %s1855_s15 = smov (%p34_p1, %s32_s15), 0  ;;  %p192_p3 = pnand %p1258_p0, %p191_p2 }
   0x6   : > { %v1437_v0 = vld [vmem:[%s1849_s1] sm:$0xff] (!%p192_p3)   ;;  %v1519_v1 = vmov (!%p192_p3), 0   ;;  %v1438_v2 = vld [vmem:[%s1849_s1 + $0x8] sm:$0xff] (!%p192_p3)   ;;  %v1439_v3 = vld [vmem:[%s1849_s1 + $0x10] sm:$0xff] (!%p192_p3)   ;;  %s1259_s22 = sshll.u32 (!%p192_p3), %s1509_s12, 5  ;;  %vm272_vm0 = vcmask (!%p192_p3), 523264  }
   0x7   : > { %195 = sbr.rel (%p192_p3) target bundleno = 337 (0x151), region = 32  ;;  %645 = vmatprep.subr.bf16.mxu0 (!%p192_p3), %v1519_v1  ;;  %1390 = vmatprep.subr.bf16.mxu1 (!%p192_p3), %v1519_v1  ;;  %p236_p4 = scmp.lt.s32.totalorder (!%p192_p3), %s1259_s22, 63  ;;  %v1440_v4 = vld [vmem:[%s1849_s1 + $0x18] sm:$0xff] (!%p192_p3)   ;;  %v1520_v5 = vmov (!%p192_p3), 0.0   ;;  %v1441_v6 = vld [vmem:[%s1849_s1 + $0x20] sm:$0xff] (!%p192_p3)   ;;  %vm589_vm1 = vcmask (!%p192_p3), 154624  }
   0x8   : > { %646 = vmatpush1.bf16.msra.mxu0 (!%p192_p3), %v1437_v0  ;;  %1400 = vmatpush1.bf16.msra.mxu1 (!%p192_p3), %v1437_v0  ;;  %273 = vst.msk [vmem:[#allocation2] sm:$0xff] (!%p192_p3), %vm272_vm0, %v1520_v5  ;;  %274 = vst.msk [vmem:[#allocation2 + $0x8] sm:$0xff] (!%p192_p3), %vm272_vm0, %v1520_v5  ;;  %v1442_v9 = vld [vmem:[%s1849_s1 + $0x28] sm:$0xff] (!%p192_p3)   ;;  %v1443_v10 = vld [vmem:[%s1849_s1 + $0x30] sm:$0xff] (!%p192_p3)   ;;  %vm638_vm2 = vcmask (!%p192_p3), 1040384   ;;  %vm639_vm3 = vcmask (!%p192_p3), 1041408  }
   0x9   : > { %647 = vmatprep.subr.bf16.mxu0 (!%p192_p3), %v1519_v1  ;;  %1391 = vmatprep.subr.bf16.mxu1 (!%p192_p3), %v1519_v1  ;;  %275 = vst.msk [vmem:[#allocation2 + $0x10] sm:$0xff] (!%p192_p3), %vm272_vm0, %v1520_v5  ;;  %276 = vst.msk [vmem:[#allocation2 + $0x18] sm:$0xff] (!%p192_p3), %vm272_vm0, %v1520_v5  ;;  %v1444_v11 = vld [vmem:[%s1849_s1 + $0x38] sm:$0xff] (!%p192_p3)   ;;  %v1521_v12 = vmov (!%p192_p3), 65535   ;;  %v1445_v14 = vld [vmem:[%s1849_s1 + $0x40] sm:$0xff] (!%p192_p3)   ;;  %vm1105_vm4 = vcmask (!%p192_p3), 519168  }
   0xa   : > { %277 = vst.msk [vmem:[#allocation2 + $0x20] sm:$0xff] (!%p192_p3), %vm272_vm0, %v1520_v5  ;;  %278 = vst.msk [vmem:[#allocation2 + $0x28] sm:$0xff] (!%p192_p3), %vm272_vm0, %v1520_v5  ;;  %v640_v13 = vsel (!%p192_p3), %vm638_vm2, 4294967295, %v1521_v12  ;;  %v1446_v15 = vld [vmem:[%s1849_s1 + $0x48] ss:$0 sps:$4 sm:$0x33] (!%p192_p3)  }
   0xb   : > { %279 = vst.msk [vmem:[#allocation2 + $0x30] sm:$0xff] (!%p192_p3), %vm272_vm0, %v1520_v5  ;;  %280 = vst.msk [vmem:[#allocation2 + $0x38] sm:$0xff] (!%p192_p3), %vm272_vm0, %v1520_v5  ;;  %v641_v16 = vsel (!%p192_p3), %vm639_vm3, %v640_v13, 0 }
   0xc   : > { %648 = vmatpush1.bf16.msra.mxu0 (!%p192_p3), %v1438_v2  ;;  %1401 = vmatpush1.bf16.msra.mxu1 (!%p192_p3), %v1438_v2  ;;  %281 = vst.msk [vmem:[#allocation2 + $0x40] sm:$0xff] (!%p192_p3), %vm272_vm0, %v1520_v5  ;;  %282 = vst.msk [vmem:[#allocation2 + $0x48] sm:$0xff] (!%p192_p3), %vm272_vm0, %v1520_v5  ;;  %v643_v17 = vand.u32 (!%p192_p3), %v1446_v15, %v641_v16  ;;  %v1707_v2 = vld [vmem:[%s1850_s2] ss:$0 sm:$0xff] (!%p192_p3) }
   0xd   : > { %649 = vmatprep.subr.bf16.mxu0 (!%p192_p3), %v1519_v1  ;;  %1392 = vmatprep.subr.bf16.mxu1 (!%p192_p3), %v1519_v1  ;;  %283 = vst.msk [vmem:[#allocation2 + $0x50] sm:$0xff] (!%p192_p3), %vm272_vm0, %v1520_v5  ;;  %284 = vst.msk [vmem:[#allocation2 + $0x58] sm:$0xff] (!%p192_p3), %vm272_vm0, %v1520_v5 }
   0xe   : > { %s1857_s22 = smov (!%p236_p4, %s1259_s22), 63  ;;  %285 = vst.msk [vmem:[#allocation2 + $0x60] sm:$0xff] %vm272_vm0, %v1520_v5  ;;  %286 = vst.msk [vmem:[#allocation2 + $0x68] sm:$0xff] %vm272_vm0, %v1520_v5 }
   0xf   : > { %s1357_s25 = sshll.u32 %s1857_s22, 3  ;;  %287 = vst.msk [vmem:[#allocation2 + $0x70] sm:$0xff] %vm272_vm0, %v1520_v5  ;;  %288 = vst.msk [vmem:[#allocation2 + $0x78] sm:$0xff] %vm272_vm0, %v1520_v5  ;;  %v305_v48 = vld [vmem:[#allocation2] sm:$0xff]  ;;  %v306_v52 = vld [vmem:[#allocation2 + $0x8] sm:$0xff]  ;;  %s1263_s19 = sshll.u32 %s1857_s22, 2 }
  0x10   : > { %650 = vmatpush1.bf16.msra.mxu0 %v1439_v3  ;;  %1402 = vmatpush1.bf16.msra.mxu1 %v1439_v3  ;;  %289 = vst.msk [vmem:[#allocation2 + $0x80] sm:$0xff] %vm272_vm0, %v1520_v5  ;;  %290 = vst.msk [vmem:[#allocation2 + $0x88] sm:$0xff] %vm272_vm0, %v1520_v5  ;;  %s1620_s28 = scalar_lea.vmem %s1848_s0, %s1357_s25  ;;  %v307_v0 = vld [vmem:[#allocation2 + $0x10] sm:$0xff]  ;;  %s1721_s22 = scalar_lea.vmem %s1851_s3, %s1263_s19 }
  0x11   : > { %651 = vmatprep.subr.bf16.mxu0 %v1519_v1  ;;  %1393 = vmatprep.subr.bf16.mxu1 %v1519_v1  ;;  %291 = vst.msk [vmem:[#allocation2 + $0x90] sm:$0xff] %vm272_vm0, %v1520_v5  ;;  %292 = vst.msk [vmem:[#allocation2 + $0x98] sm:$0xff] %vm272_vm0, %v1520_v5  ;;  %v1449_v7 = vld [vmem:[%s1620_s28 + $0x4] ss:$8 sps:$4 sm:$0xff]   ;;  %v1447_v18 = vld [vmem:[%s1620_s28] ss:$8 sps:$4 sm:$0xff]  }
  0x12   : > { %293 = vst.msk [vmem:[#allocation2 + $0xa0] sm:$0xff] %vm272_vm0, %v1520_v5  ;;  %294 = vst.msk [vmem:[#allocation2 + $0xa8] sm:$0xff] %vm272_vm0, %v1520_v5  ;;  %v1452_v8 = vld [vmem:[%s1620_s28 + $0x84] ss:$8 sps:$4 sm:$0xff]   ;;  %1306 = vmatprep.mubr.msk.bf16.mxu0 %vm589_vm1, %v1449_v7  ;;  %v1450_v19 = vld [vmem:[%s1620_s28 + $0x80] ss:$8 sps:$4 sm:$0xff]  }
  0x13   : > { %295 = vst.msk [vmem:[#allocation2 + $0xb0] sm:$0xff] %vm272_vm0, %v1520_v5  ;;  %296 = vst.msk [vmem:[#allocation2 + $0xb8] sm:$0xff] %vm272_vm0, %v1520_v5  ;;  %1314 = vmatprep.mubr.msk.bf16.mxu1 %vm589_vm1, %v1452_v8  ;;  %v1453_v20 = vld [vmem:[%s1620_s28 + $0x14] ss:$8 sps:$4 sm:$0xff]   ;;  %v1457_v22 = vld [vmem:[%s1620_s28 + $0x10] ss:$8 sps:$4 sm:$0xff]  }
  0x14   : > { %297 = vst.msk [vmem:[#allocation2 + $0xc0] sm:$0xff] %vm272_vm0, %v1520_v5  ;;  %298 = vst.msk [vmem:[#allocation2 + $0xc8] sm:$0xff] %vm272_vm0, %v1520_v5  ;;  %652 = vmatpush1.bf16.msra.mxu0 %v1440_v4  ;;  %1403 = vmatpush1.bf16.msra.mxu1 %v1440_v4  ;;  %v1455_v21 = vld [vmem:[%s1620_s28 + $0x94] ss:$8 sps:$4 sm:$0xff]   ;;  %v1458_v23 = vld [vmem:[%s1620_s28 + $0x90] ss:$8 sps:$4 sm:$0xff]  }
  0x15   : > { %299 = vst.msk [vmem:[#allocation2 + $0xd0] sm:$0xff] %vm272_vm0, %v1520_v5  ;;  %300 = vst.msk [vmem:[#allocation2 + $0xd8] sm:$0xff] %vm272_vm0, %v1520_v5  ;;  %653 = vmatprep.subr.bf16.mxu0 %v1519_v1  ;;  %1394 = vmatprep.subr.bf16.mxu1 %v1519_v1  ;;  %v1459_v24 = vld [vmem:[%s1620_s28 + $0x24] ss:$8 sps:$4 sm:$0xff]   ;;  %v1463_v26 = vld [vmem:[%s1620_s28 + $0x20] ss:$8 sps:$4 sm:$0xff]  }
  0x16   : > { %301 = vst.msk [vmem:[#allocation2 + $0xe0] sm:$0xff] %vm272_vm0, %v1520_v5  ;;  %302 = vst.msk [vmem:[#allocation2 + $0xe8] sm:$0xff] %vm272_vm0, %v1520_v5  ;;  %v1461_v25 = vld [vmem:[%s1620_s28 + $0xa4] ss:$8 sps:$4 sm:$0xff]   ;;  %v1464_v27 = vld [vmem:[%s1620_s28 + $0xa0] ss:$8 sps:$4 sm:$0xff]  }
  0x17   : > { %303 = vst.msk [vmem:[#allocation2 + $0xf0] sm:$0xff] %vm272_vm0, %v1520_v5  ;;  %304 = vst.msk [vmem:[#allocation2 + $0xf8] sm:$0xff] %vm272_vm0, %v1520_v5  ;;  %v1465_v28 = vld [vmem:[%s1620_s28 + $0x34] ss:$8 sps:$4 sm:$0xff]   ;;  %v1469_v30 = vld [vmem:[%s1620_s28 + $0x30] ss:$8 sps:$4 sm:$0xff]  }
  0x18   : > { %654 = vmatpush1.bf16.msra.mxu0 %v1441_v6  ;;  %1404 = vmatpush1.bf16.msra.mxu1 %v1441_v6  ;;  %v1467_v29 = vld [vmem:[%s1620_s28 + $0xb4] ss:$8 sps:$4 sm:$0xff]   ;;  %v1470_v31 = vld [vmem:[%s1620_s28 + $0xb0] ss:$8 sps:$4 sm:$0xff]   ;;  %v1471_v32 = vld [vmem:[%s1620_s28 + $0x44] ss:$8 sps:$4 sm:$0xff]  }
  0x19   : > { %655 = vmatprep.subr.bf16.mxu0 %v1519_v1  ;;  %1395 = vmatprep.subr.bf16.mxu1 %v1519_v1  ;;  %v1473_v33 = vld [vmem:[%s1620_s28 + $0xc4] ss:$8 sps:$4 sm:$0xff]   ;;  %v1475_v34 = vld [vmem:[%s1620_s28 + $0x40] ss:$8 sps:$4 sm:$0xff]   ;;  %v1477_v36 = vld [vmem:[%s1620_s28 + $0x54] ss:$8 sps:$4 sm:$0xff]  }
  0x1a   : > { %v1476_v35 = vld [vmem:[%s1620_s28 + $0xc0] ss:$8 sps:$4 sm:$0xff]   ;;  %v1479_v37 = vld [vmem:[%s1620_s28 + $0xd4] ss:$8 sps:$4 sm:$0xff]   ;;  %v1481_v38 = vld [vmem:[%s1620_s28 + $0x50] ss:$8 sps:$4 sm:$0xff]  }
  0x1b   : > { %v1482_v39 = vld [vmem:[%s1620_s28 + $0xd0] ss:$8 sps:$4 sm:$0xff]   ;;  %v1483_v40 = vld [vmem:[%s1620_s28 + $0x64] ss:$8 sps:$4 sm:$0xff]   ;;  %v1487_v42 = vld [vmem:[%s1620_s28 + $0x60] ss:$8 sps:$4 sm:$0xff]  }
  0x1c   : > { %656 = vmatpush1.bf16.msra.mxu0 %v1442_v9  ;;  %1405 = vmatpush1.bf16.msra.mxu1 %v1442_v9  ;;  %v1485_v41 = vld [vmem:[%s1620_s28 + $0xe4] ss:$8 sps:$4 sm:$0xff]   ;;  %v1488_v43 = vld [vmem:[%s1620_s28 + $0xe0] ss:$8 sps:$4 sm:$0xff]   ;;  %v1489_v44 = vld [vmem:[%s1620_s28 + $0x74] ss:$8 sps:$4 sm:$0xff]  }
  0x1d   : > { %657 = vmatprep.subr.bf16.mxu0 %v1519_v1  ;;  %1396 = vmatprep.subr.bf16.mxu1 %v1519_v1  ;;  %v1491_v45 = vld [vmem:[%s1620_s28 + $0xf4] ss:$8 sps:$4 sm:$0xff]   ;;  %v1493_v46 = vld [vmem:[%s1620_s28 + $0x70] ss:$8 sps:$4 sm:$0xff]   ;;  %v321_v49 = vld [vmem:[#allocation2 + $0x80] sm:$0xff] }
  0x1e   : > { %v1494_v47 = vld [vmem:[%s1620_s28 + $0xf0] ss:$8 sps:$4 sm:$0xff]   ;;  %v322_v53 = vld [vmem:[#allocation2 + $0x88] sm:$0xff] }
  0x1f   : > { %v308_v5 = vld [vmem:[#allocation2 + $0x18] sm:$0xff] }
  0x20   : > { %658 = vmatpush1.bf16.msra.mxu0 %v1443_v10  ;;  %1406 = vmatpush1.bf16.msra.mxu1 %v1443_v10  ;;  %v324_v6 = vld [vmem:[#allocation2 + $0x98] sm:$0xff] }
  0x21   : > { %659 = vmatprep.subr.bf16.mxu0 %v1519_v1  ;;  %1397 = vmatprep.subr.bf16.mxu1 %v1519_v1 }
  0x24   : > { %660 = vmatpush1.bf16.msra.mxu0 %v1444_v11  ;;  %1407 = vmatpush1.bf16.msra.mxu1 %v1444_v11 }
  0x25   : > { %661 = vmatprep.subr.bf16.mxu0 %v1519_v1  ;;  %1398 = vmatprep.subr.bf16.mxu1 %v1519_v1 }
  0x28   : > { %662 = vmatpush1.bf16.msra.mxu0 %v1445_v14  ;;  %1408 = vmatpush1.bf16.msra.mxu1 %v1445_v14 }
  0x29   : > { %663 = vmatprep.subr.bf16.mxu0 %v1519_v1  ;;  %1399 = vmatprep.subr.bf16.mxu1 %v1519_v1  ;;  %v323_v1 = vld [vmem:[#allocation2 + $0x90] sm:$0xff] }
  0x2c   : > { %664 = vmatpush1.bf16.msra.mxu0 %v643_v17  ;;  %1409 = vmatpush1.bf16.msra.mxu1 %v643_v17 }
  0x2f   : > { %678 = vmatmul.mubr.bf16.vlgmr.msra.gmra.mrb[0].mxu0 %v1447_v18  ;;  %742 = vmatmul.mubr.bf16.vlgmr.msra.gmra.mrb[0].mxu1 %v1450_v19 }
  0x30   : > { %1307 = vmatprep.mubr.msk.bf16.mxu0 %vm589_vm1, %v1453_v20  ;;  %1315 = vmatprep.mubr.msk.bf16.mxu1 %vm589_vm1, %v1455_v21 }
  0x37   : > { %686 = vmatmul.mubr.bf16.gmra.mrb[4].mxu0 %v1457_v22  ;;  %750 = vmatmul.mubr.bf16.gmra.mrb[4].mxu1 %v1458_v23 }
  0x38   : > { %1308 = vmatprep.mubr.msk.bf16.mxu0 %vm589_vm1, %v1459_v24  ;;  %1316 = vmatprep.mubr.msk.bf16.mxu1 %vm589_vm1, %v1461_v25 }
  0x3f   : > { %694 = vmatmul.mubr.bf16.gmra.mrb[8].mxu0 %v1463_v26  ;;  %758 = vmatmul.mubr.bf16.gmra.mrb[8].mxu1 %v1464_v27  ;;  %v309_v27 = vld [vmem:[#allocation2 + $0x20] sm:$0xff] }
  0x40   : > { %1309 = vmatprep.mubr.msk.bf16.mxu0 %vm589_vm1, %v1465_v28  ;;  %1317 = vmatprep.mubr.msk.bf16.mxu1 %vm589_vm1, %v1467_v29  ;;  %v325_v28 = vld [vmem:[#allocation2 + $0xa0] sm:$0xff] }
  0x47   : > { %702 = vmatmul.mubr.bf16.gmra.mrb[12].mxu0 %v1469_v30  ;;  %766 = vmatmul.mubr.bf16.gmra.mrb[12].mxu1 %v1470_v31 }
  0x48   : > { %1310 = vmatprep.mubr.msk.bf16.mxu0 %vm589_vm1, %v1471_v32  ;;  %1318 = vmatprep.mubr.msk.bf16.mxu1 %vm589_vm1, %v1473_v33 }
  0x4f   : > { %710 = vmatmul.mubr.bf16.gmra.mrb[16].mxu0 %v1475_v34  ;;  %774 = vmatmul.mubr.bf16.gmra.mrb[16].mxu1 %v1476_v35  ;;  %v310_v35 = vld [vmem:[#allocation2 + $0x28] sm:$0xff] }
  0x50   : > { %1311 = vmatprep.mubr.msk.bf16.mxu0 %vm589_vm1, %v1477_v36  ;;  %1319 = vmatprep.mubr.msk.bf16.mxu1 %vm589_vm1, %v1479_v37  ;;  %v326_v36 = vld [vmem:[#allocation2 + $0xa8] sm:$0xff] }
  0x57   : > { %718 = vmatmul.mubr.bf16.gmra.mrb[20].mxu0 %v1481_v38  ;;  %782 = vmatmul.mubr.bf16.gmra.mrb[20].mxu1 %v1482_v39 }
  0x58   : > { %1312 = vmatprep.mubr.msk.bf16.mxu0 %vm589_vm1, %v1483_v40  ;;  %1320 = vmatprep.mubr.msk.bf16.mxu1 %vm589_vm1, %v1485_v41 }
  0x5f   : > { %726 = vmatmul.mubr.bf16.gmra.mrb[24].mxu0 %v1487_v42  ;;  %790 = vmatmul.mubr.bf16.gmra.mrb[24].mxu1 %v1488_v43 }
  0x60   : > { %1313 = vmatprep.mubr.msk.bf16.mxu0 %vm589_vm1, %v1489_v44  ;;  %1321 = vmatprep.mubr.msk.bf16.mxu1 %vm589_vm1, %v1491_v45 }
  0x67   : > { %734 = vmatmul.mubr.bf16.gmra.mrb[28].mxu0 %v1493_v46  ;;  %798 = vmatmul.mubr.bf16.gmra.mrb[28].mxu1 %v1494_v47 }
 0x102   : > { %v679_v50 = vpop.f32.mrb[0].mxu0  ;;  %v743_v51 = vpop.f32.mrb[0].mxu1 }
 0x103   : > { %v806_v54 = vadd.f32 %v679_v50, %v305_v48  ;;  %v822_v55 = vadd.f32 %v743_v51, %v321_v49  ;;  %v681_v56 = vpop.f32.mrb[1].mxu0  ;;  %v745_v57 = vpop.f32.mrb[1].mxu1 }
 0x104   : > { %v682_v58 = vpop.f32.mrb[2].mxu0  ;;  %v746_v59 = vpop.f32.mrb[2].mxu1 }
 0x105   : > { %839 = vst.msk [vmem:[#allocation2] sm:$0xff] %vm272_vm0, %v806_v54  ;;  %855 = vst.msk [vmem:[#allocation2 + $0x80] sm:$0xff] %vm272_vm0, %v822_v55  ;;  %v807_v60 = vadd.f32 %v682_v58, %v306_v52  ;;  %v823_v61 = vadd.f32 %v746_v59, %v322_v53  ;;  %v684_v62 = vpop.f32.mrb[3].mxu0  ;;  %v748_v63 = vpop.f32.mrb[3].mxu1  ;;  %v311_v59 = vld [vmem:[#allocation2 + $0x30] sm:$0xff] }
 0x107   : > { %840 = vst.msk [vmem:[#allocation2 + $0x8] sm:$0xff] %vm272_vm0, %v807_v60  ;;  %856 = vst.msk [vmem:[#allocation2 + $0x88] sm:$0xff] %vm272_vm0, %v823_v61  ;;  %v327_v60 = vld [vmem:[#allocation2 + $0xb0] sm:$0xff] }
 0x10a   : > { %v687_v3 = vpop.f32.mrb[4].mxu0  ;;  %v751_v4 = vpop.f32.mrb[4].mxu1 }
 0x10b   : > { %v808_v7 = vadd.f32 %v687_v3, %v307_v0  ;;  %v824_v8 = vadd.f32 %v751_v4, %v323_v1  ;;  %v689_v9 = vpop.f32.mrb[5].mxu0  ;;  %v753_v10 = vpop.f32.mrb[5].mxu1  ;;  %v312_v4 = vld [vmem:[#allocation2 + $0x38] sm:$0xff] }
 0x10c   : > { %v874_v11 = vld [vmem:[#allocation2] sm:$0xff]  ;;  %v690_v13 = vpop.f32.mrb[6].mxu0  ;;  %v754_v14 = vpop.f32.mrb[6].mxu1 }
 0x10d   : > { %v890_v12 = vld [vmem:[#allocation2 + $0x80] sm:$0xff]  ;;  %v913_v15 = vadd.f32 %v1707_v2, %v874_v11  ;;  %841 = vst.msk [vmem:[#allocation2 + $0x10] sm:$0xff] %vm272_vm0, %v808_v7  ;;  %857 = vst.msk [vmem:[#allocation2 + $0x90] sm:$0xff] %vm272_vm0, %v824_v8  ;;  %v809_v17 = vadd.f32 %v690_v13, %v308_v5  ;;  %v825_v18 = vadd.f32 %v754_v14, %v324_v6  ;;  %v692_v19 = vpop.f32.mrb[7].mxu0  ;;  %v756_v20 = vpop.f32.mrb[7].mxu1  ;;  %v328_v5 = vld [vmem:[#allocation2 + $0xb8] sm:$0xff] }
 0x10e   : > { %v929_v16 = vadd.f32 %v1707_v2, %v890_v12  ;;  %v875_v21 = vld [vmem:[#allocation2 + $0x8] sm:$0xff] }
 0x10f   : > { %v891_v22 = vld [vmem:[#allocation2 + $0x88] sm:$0xff]  ;;  %v945_v23 = vmax.f32 %v913_v15, 0.0  ;;  %v914_v25 = vadd.f32 %v1707_v2, %v875_v21  ;;  %842 = vst.msk [vmem:[#allocation2 + $0x18] sm:$0xff] %vm272_vm0, %v809_v17  ;;  %858 = vst.msk [vmem:[#allocation2 + $0x98] sm:$0xff] %vm272_vm0, %v825_v18 }
 0x110   : > { %v961_v24 = vmax.f32 %v929_v16, 0.0  ;;  %v930_v26 = vadd.f32 %v1707_v2, %v891_v22 }
 0x111   : > { %v1358_v29 = vpack.c.bf16 %v945_v23, %v945_v23  ;;  %v946_v31 = vmax.f32 %v914_v25, 0.0 }
 0x112   : > { %v1374_v30 = vpack.c.bf16 %v961_v24, %v961_v24  ;;  %v962_v32 = vmax.f32 %v930_v26, 0.0  ;;  %v695_v33 = vpop.f32.mrb[8].mxu0  ;;  %v759_v34 = vpop.f32.mrb[8].mxu1 }
 0x113   : > { %1106 = vst.msk [vmem:[%s1721_s22] sm:$0xf] %vm1105_vm4, %v1358_v29  ;;  %v1359_v37 = vpack.c.bf16 %v946_v31, %v946_v31  ;;  %v810_v39 = vadd.f32 %v695_v33, %v309_v27  ;;  %v826_v40 = vadd.f32 %v759_v34, %v325_v28  ;;  %v697_v41 = vpop.f32.mrb[9].mxu0  ;;  %v761_v42 = vpop.f32.mrb[9].mxu1  ;;  %v313_v28 = vld [vmem:[#allocation2 + $0x40] sm:$0xff] }
 0x114   : > { %1122 = vst.msk [vmem:[%s1721_s22 + $0x40] sm:$0xf] %vm1105_vm4, %v1374_v30  ;;  %v1375_v38 = vpack.c.bf16 %v962_v32, %v962_v32  ;;  %v876_v43 = vld [vmem:[#allocation2 + $0x10] sm:$0xff]  ;;  %v698_v45 = vpop.f32.mrb[10].mxu0  ;;  %v762_v46 = vpop.f32.mrb[10].mxu1  ;;  %v329_v29 = vld [vmem:[#allocation2 + $0xc0] sm:$0xff] }
 0x115   : > { %v892_v44 = vld [vmem:[#allocation2 + $0x90] sm:$0xff]  ;;  %1107 = vst.msk [vmem:[%s1721_s22 + $0x4] sm:$0xf] %vm1105_vm4, %v1359_v37  ;;  %v915_v47 = vadd.f32 %v1707_v2, %v876_v43  ;;  %v811_v49 = vadd.f32 %v698_v45, %v310_v35  ;;  %v827_v50 = vadd.f32 %v762_v46, %v326_v36  ;;  %v700_v51 = vpop.f32.mrb[11].mxu0  ;;  %v764_v52 = vpop.f32.mrb[11].mxu1  ;;  %v314_v36 = vld [vmem:[#allocation2 + $0x48] sm:$0xff] }
 0x116   : > { %1123 = vst.msk [vmem:[%s1721_s22 + $0x44] sm:$0xf] %vm1105_vm4, %v1375_v38  ;;  %v931_v48 = vadd.f32 %v1707_v2, %v892_v44  ;;  %v877_v53 = vld [vmem:[#allocation2 + $0x18] sm:$0xff]  ;;  %v330_v37 = vld [vmem:[#allocation2 + $0xc8] sm:$0xff] }
 0x117   : > { %843 = vst.msk [vmem:[#allocation2 + $0x20] sm:$0xff] %vm272_vm0, %v810_v39  ;;  %859 = vst.msk [vmem:[#allocation2 + $0xa0] sm:$0xff] %vm272_vm0, %v826_v40  ;;  %v893_v54 = vld [vmem:[#allocation2 + $0x98] sm:$0xff]  ;;  %v947_v55 = vmax.f32 %v915_v47, 0.0  ;;  %v916_v57 = vadd.f32 %v1707_v2, %v877_v53 }
 0x118   : > { %v963_v56 = vmax.f32 %v931_v48, 0.0  ;;  %v932_v58 = vadd.f32 %v1707_v2, %v893_v54  ;;  %844 = vst.msk [vmem:[#allocation2 + $0x28] sm:$0xff] %vm272_vm0, %v811_v49  ;;  %860 = vst.msk [vmem:[#allocation2 + $0xa8] sm:$0xff] %vm272_vm0, %v827_v50 }
 0x119   : > { %v1360_v61 = vpack.c.bf16 %v947_v55, %v947_v55  ;;  %v948_v63 = vmax.f32 %v916_v57, 0.0 }
 0x11a   : > { %v1376_v62 = vpack.c.bf16 %v963_v56, %v963_v56  ;;  %v964_v0 = vmax.f32 %v932_v58, 0.0  ;;  %v703_v1 = vpop.f32.mrb[12].mxu0  ;;  %v767_v3 = vpop.f32.mrb[12].mxu1 }
 0x11b   : > { %1108 = vst.msk [vmem:[%s1721_s22 + $0x8] sm:$0xf] %vm1105_vm4, %v1360_v61  ;;  %v1361_v6 = vpack.c.bf16 %v948_v63, %v948_v63  ;;  %v812_v8 = vadd.f32 %v703_v1, %v311_v59  ;;  %v828_v9 = vadd.f32 %v767_v3, %v327_v60  ;;  %v705_v10 = vpop.f32.mrb[13].mxu0  ;;  %v769_v11 = vpop.f32.mrb[13].mxu1  ;;  %v315_v60 = vld [vmem:[#allocation2 + $0x50] sm:$0xff] }
 0x11c   : > { %1124 = vst.msk [vmem:[%s1721_s22 + $0x48] sm:$0xf] %vm1105_vm4, %v1376_v62  ;;  %v1377_v7 = vpack.c.bf16 %v964_v0, %v964_v0  ;;  %v706_v14 = vpop.f32.mrb[14].mxu0  ;;  %v770_v15 = vpop.f32.mrb[14].mxu1  ;;  %v331_v61 = vld [vmem:[#allocation2 + $0xd0] sm:$0xff] }
 0x11d   : > { %1109 = vst.msk [vmem:[%s1721_s22 + $0xc] sm:$0xf] %vm1105_vm4, %v1361_v6  ;;  %v813_v18 = vadd.f32 %v706_v14, %v312_v4  ;;  %v829_v19 = vadd.f32 %v770_v15, %v328_v5  ;;  %v708_v20 = vpop.f32.mrb[15].mxu0  ;;  %v772_v21 = vpop.f32.mrb[15].mxu1  ;;  %v316_v5 = vld [vmem:[#allocation2 + $0x58] sm:$0xff] }
 0x11e   : > { %v878_v12 = vld [vmem:[#allocation2 + $0x20] sm:$0xff]  ;;  %1125 = vst.msk [vmem:[%s1721_s22 + $0x4c] sm:$0xf] %vm1105_vm4, %v1377_v7  ;;  %v332_v6 = vld [vmem:[#allocation2 + $0xd8] sm:$0xff] }
 0x11f   : > { %v894_v13 = vld [vmem:[#allocation2 + $0xa0] sm:$0xff]  ;;  %v917_v16 = vadd.f32 %v1707_v2, %v878_v12  ;;  %845 = vst.msk [vmem:[#allocation2 + $0x30] sm:$0xff] %vm272_vm0, %v812_v8  ;;  %861 = vst.msk [vmem:[#allocation2 + $0xb0] sm:$0xff] %vm272_vm0, %v828_v9  ;;  %v879_v22 = vld [vmem:[#allocation2 + $0x28] sm:$0xff] }
 0x120   : > { %v933_v17 = vadd.f32 %v1707_v2, %v894_v13  ;;  %v895_v23 = vld [vmem:[#allocation2 + $0xa8] sm:$0xff]  ;;  %v918_v26 = vadd.f32 %v1707_v2, %v879_v22  ;;  %846 = vst.msk [vmem:[#allocation2 + $0x38] sm:$0xff] %vm272_vm0, %v813_v18  ;;  %862 = vst.msk [vmem:[#allocation2 + $0xb8] sm:$0xff] %vm272_vm0, %v829_v19 }
 0x121   : > { %v949_v24 = vmax.f32 %v917_v16, 0.0  ;;  %v934_v27 = vadd.f32 %v1707_v2, %v895_v23 }
 0x122   : > { %v965_v25 = vmax.f32 %v933_v17, 0.0  ;;  %v950_v32 = vmax.f32 %v918_v26, 0.0  ;;  %v711_v34 = vpop.f32.mrb[16].mxu0  ;;  %v775_v35 = vpop.f32.mrb[16].mxu1 }
 0x123   : > { %v1362_v30 = vpack.c.bf16 %v949_v24, %v949_v24  ;;  %v966_v33 = vmax.f32 %v934_v27, 0.0  ;;  %v814_v40 = vadd.f32 %v711_v34, %v313_v28  ;;  %v830_v41 = vadd.f32 %v775_v35, %v329_v29  ;;  %v713_v42 = vpop.f32.mrb[17].mxu0  ;;  %v777_v43 = vpop.f32.mrb[17].mxu1  ;;  %v317_v29 = vld [vmem:[#allocation2 + $0x60] sm:$0xff] }
 0x124   : > { %v1378_v31 = vpack.c.bf16 %v965_v25, %v965_v25  ;;  %v1363_v38 = vpack.c.bf16 %v950_v32, %v950_v32  ;;  %v714_v46 = vpop.f32.mrb[18].mxu0  ;;  %v778_v47 = vpop.f32.mrb[18].mxu1 }
 0x125   : > { %1110 = vst.msk [vmem:[%s1721_s22 + $0x10] sm:$0xf] %vm1105_vm4, %v1362_v30  ;;  %v1379_v39 = vpack.c.bf16 %v966_v33, %v966_v33  ;;  %v815_v50 = vadd.f32 %v714_v46, %v314_v36  ;;  %v831_v51 = vadd.f32 %v778_v47, %v330_v37  ;;  %v716_v52 = vpop.f32.mrb[19].mxu0  ;;  %v780_v53 = vpop.f32.mrb[19].mxu1  ;;  %v333_v30 = vld [vmem:[#allocation2 + $0xe0] sm:$0xff]  ;;  %v318_v37 = vld [vmem:[#allocation2 + $0x68] sm:$0xff] }
 0x126   : > { %1126 = vst.msk [vmem:[%s1721_s22 + $0x50] sm:$0xf] %vm1105_vm4, %v1378_v31  ;;  %v880_v44 = vld [vmem:[#allocation2 + $0x30] sm:$0xff]  ;;  %1111 = vst.msk [vmem:[%s1721_s22 + $0x14] sm:$0xf] %vm1105_vm4, %v1363_v38  ;;  %v334_v38 = vld [vmem:[#allocation2 + $0xe8] sm:$0xff] }
 0x127   : > { %v896_v45 = vld [vmem:[#allocation2 + $0xb0] sm:$0xff]  ;;  %1127 = vst.msk [vmem:[%s1721_s22 + $0x54] sm:$0xf] %vm1105_vm4, %v1379_v39  ;;  %v919_v48 = vadd.f32 %v1707_v2, %v880_v44  ;;  %v881_v54 = vld [vmem:[#allocation2 + $0x38] sm:$0xff] }
 0x128   : > { %v935_v49 = vadd.f32 %v1707_v2, %v896_v45  ;;  %847 = vst.msk [vmem:[#allocation2 + $0x40] sm:$0xff] %vm272_vm0, %v814_v40  ;;  %863 = vst.msk [vmem:[#allocation2 + $0xc0] sm:$0xff] %vm272_vm0, %v830_v41  ;;  %v897_v55 = vld [vmem:[#allocation2 + $0xb8] sm:$0xff]  ;;  %v920_v58 = vadd.f32 %v1707_v2, %v881_v54 }
 0x129   : > { %v951_v56 = vmax.f32 %v919_v48, 0.0  ;;  %v936_v59 = vadd.f32 %v1707_v2, %v897_v55  ;;  %848 = vst.msk [vmem:[#allocation2 + $0x48] sm:$0xff] %vm272_vm0, %v815_v50  ;;  %864 = vst.msk [vmem:[#allocation2 + $0xc8] sm:$0xff] %vm272_vm0, %v831_v51 }
 0x12a   : > { %v967_v57 = vmax.f32 %v935_v49, 0.0  ;;  %v952_v0 = vmax.f32 %v920_v58, 0.0  ;;  %v719_v3 = vpop.f32.mrb[20].mxu0  ;;  %v783_v4 = vpop.f32.mrb[20].mxu1 }
 0x12b   : > { %v1364_v62 = vpack.c.bf16 %v951_v56, %v951_v56  ;;  %v968_v1 = vmax.f32 %v936_v59, 0.0  ;;  %v816_v9 = vadd.f32 %v719_v3, %v315_v60  ;;  %v832_v10 = vadd.f32 %v783_v4, %v331_v61  ;;  %v721_v11 = vpop.f32.mrb[21].mxu0  ;;  %v785_v12 = vpop.f32.mrb[21].mxu1  ;;  %v319_v61 = vld [vmem:[#allocation2 + $0x70] sm:$0xff] }
 0x12c   : > { %v1380_v63 = vpack.c.bf16 %v967_v57, %v967_v57  ;;  %v1365_v7 = vpack.c.bf16 %v952_v0, %v952_v0  ;;  %v722_v15 = vpop.f32.mrb[22].mxu0  ;;  %v786_v16 = vpop.f32.mrb[22].mxu1 }
 0x12d   : > { %1112 = vst.msk [vmem:[%s1721_s22 + $0x18] sm:$0xf] %vm1105_vm4, %v1364_v62  ;;  %v1381_v8 = vpack.c.bf16 %v968_v1, %v968_v1  ;;  %v817_v19 = vadd.f32 %v722_v15, %v316_v5  ;;  %v833_v20 = vadd.f32 %v786_v16, %v332_v6  ;;  %v724_v21 = vpop.f32.mrb[23].mxu0  ;;  %v788_v22 = vpop.f32.mrb[23].mxu1  ;;  %v335_v62 = vld [vmem:[#allocation2 + $0xf0] sm:$0xff]  ;;  %v320_v6 = vld [vmem:[#allocation2 + $0x78] sm:$0xff] }
 0x12e   : > { %1128 = vst.msk [vmem:[%s1721_s22 + $0x58] sm:$0xf] %vm1105_vm4, %v1380_v63  ;;  %1113 = vst.msk [vmem:[%s1721_s22 + $0x1c] sm:$0xf] %vm1105_vm4, %v1365_v7  ;;  %v336_v7 = vld [vmem:[#allocation2 + $0xf8] sm:$0xff] }
 0x12f   : > { %v882_v13 = vld [vmem:[#allocation2 + $0x40] sm:$0xff]  ;;  %1129 = vst.msk [vmem:[%s1721_s22 + $0x5c] sm:$0xf] %vm1105_vm4, %v1381_v8 }
 0x130   : > { %v898_v14 = vld [vmem:[#allocation2 + $0xc0] sm:$0xff]  ;;  %v921_v17 = vadd.f32 %v1707_v2, %v882_v13  ;;  %849 = vst.msk [vmem:[#allocation2 + $0x50] sm:$0xff] %vm272_vm0, %v816_v9  ;;  %865 = vst.msk [vmem:[#allocation2 + $0xd0] sm:$0xff] %vm272_vm0, %v832_v10  ;;  %v883_v23 = vld [vmem:[#allocation2 + $0x48] sm:$0xff] }
 0x131   : > { %v937_v18 = vadd.f32 %v1707_v2, %v898_v14  ;;  %v899_v24 = vld [vmem:[#allocation2 + $0xc8] sm:$0xff]  ;;  %v922_v27 = vadd.f32 %v1707_v2, %v883_v23  ;;  %850 = vst.msk [vmem:[#allocation2 + $0x58] sm:$0xff] %vm272_vm0, %v817_v19  ;;  %866 = vst.msk [vmem:[#allocation2 + $0xd8] sm:$0xff] %vm272_vm0, %v833_v20 }
 0x132   : > { %v953_v25 = vmax.f32 %v921_v17, 0.0  ;;  %v938_v28 = vadd.f32 %v1707_v2, %v899_v24  ;;  %v727_v35 = vpop.f32.mrb[24].mxu0  ;;  %v791_v36 = vpop.f32.mrb[24].mxu1 }
 0x133   : > { %v969_v26 = vmax.f32 %v937_v18, 0.0  ;;  %v954_v33 = vmax.f32 %v922_v27, 0.0  ;;  %v818_v41 = vadd.f32 %v727_v35, %v317_v29  ;;  %v834_v42 = vadd.f32 %v791_v36, %v333_v30  ;;  %v729_v43 = vpop.f32.mrb[25].mxu0  ;;  %v793_v44 = vpop.f32.mrb[25].mxu1 }
 0x134   : > { %v1366_v31 = vpack.c.bf16 %v953_v25, %v953_v25  ;;  %v970_v34 = vmax.f32 %v938_v28, 0.0  ;;  %v730_v47 = vpop.f32.mrb[26].mxu0  ;;  %v794_v48 = vpop.f32.mrb[26].mxu1 }
 0x135   : > { %v1382_v32 = vpack.c.bf16 %v969_v26, %v969_v26  ;;  %v1367_v39 = vpack.c.bf16 %v954_v33, %v954_v33  ;;  %851 = vst.msk [vmem:[#allocation2 + $0x60] sm:$0xff] %vm272_vm0, %v818_v41  ;;  %867 = vst.msk [vmem:[#allocation2 + $0xe0] sm:$0xff] %vm272_vm0, %v834_v42  ;;  %v819_v51 = vadd.f32 %v730_v47, %v318_v37  ;;  %v732_v53 = vpop.f32.mrb[27].mxu0  ;;  %v796_v54 = vpop.f32.mrb[27].mxu1 }
 0x136   : > { %1114 = vst.msk [vmem:[%s1721_s22 + $0x20] sm:$0xf] %vm1105_vm4, %v1366_v31  ;;  %v1383_v40 = vpack.c.bf16 %v970_v34, %v970_v34  ;;  %v835_v52 = vadd.f32 %v794_v48, %v334_v38 }
 0x137   : > { %1130 = vst.msk [vmem:[%s1721_s22 + $0x60] sm:$0xf] %vm1105_vm4, %v1382_v32  ;;  %v884_v45 = vld [vmem:[#allocation2 + $0x50] sm:$0xff]  ;;  %1115 = vst.msk [vmem:[%s1721_s22 + $0x24] sm:$0xf] %vm1105_vm4, %v1367_v39 }
 0x138   : > { %v900_v46 = vld [vmem:[#allocation2 + $0xd0] sm:$0xff]  ;;  %1131 = vst.msk [vmem:[%s1721_s22 + $0x64] sm:$0xf] %vm1105_vm4, %v1383_v40  ;;  %v923_v49 = vadd.f32 %v1707_v2, %v884_v45  ;;  %v885_v55 = vld [vmem:[#allocation2 + $0x58] sm:$0xff] }
 0x139   : > { %v939_v50 = vadd.f32 %v1707_v2, %v900_v46  ;;  %v901_v56 = vld [vmem:[#allocation2 + $0xd8] sm:$0xff]  ;;  %v924_v59 = vadd.f32 %v1707_v2, %v885_v55  ;;  %852 = vst.msk [vmem:[#allocation2 + $0x68] sm:$0xff] %vm272_vm0, %v819_v51  ;;  %868 = vst.msk [vmem:[#allocation2 + $0xe8] sm:$0xff] %vm272_vm0, %v835_v52 }
 0x13a   : > { %v955_v57 = vmax.f32 %v923_v49, 0.0  ;;  %v940_v60 = vadd.f32 %v1707_v2, %v901_v56  ;;  %v735_v4 = vpop.f32.mrb[28].mxu0  ;;  %v799_v5 = vpop.f32.mrb[28].mxu1 }
 0x13b   : > { %v971_v58 = vmax.f32 %v939_v50, 0.0  ;;  %v956_v1 = vmax.f32 %v924_v59, 0.0  ;;  %v820_v10 = vadd.f32 %v735_v4, %v319_v61  ;;  %v836_v11 = vadd.f32 %v799_v5, %v335_v62  ;;  %v737_v12 = vpop.f32.mrb[29].mxu0  ;;  %v801_v13 = vpop.f32.mrb[29].mxu1 }
 0x13c   : > { %v1368_v63 = vpack.c.bf16 %v955_v57, %v955_v57  ;;  %v972_v3 = vmax.f32 %v940_v60, 0.0  ;;  %v886_v14 = vld [vmem:[#allocation2 + $0x60] sm:$0xff]  ;;  %v738_v16 = vpop.f32.mrb[30].mxu0  ;;  %v802_v17 = vpop.f32.mrb[30].mxu1 }
 0x13d   : > { %v1384_v0 = vpack.c.bf16 %v971_v58, %v971_v58  ;;  %v1369_v8 = vpack.c.bf16 %v956_v1, %v956_v1  ;;  %v902_v15 = vld [vmem:[#allocation2 + $0xe0] sm:$0xff]  ;;  %v925_v18 = vadd.f32 %v1707_v2, %v886_v14  ;;  %853 = vst.msk [vmem:[#allocation2 + $0x70] sm:$0xff] %vm272_vm0, %v820_v10  ;;  %869 = vst.msk [vmem:[#allocation2 + $0xf0] sm:$0xff] %vm272_vm0, %v836_v11  ;;  %v740_v22 = vpop.f32.mrb[31].mxu0  ;;  %v804_v23 = vpop.f32.mrb[31].mxu1 }
 0x13e   : > { %1116 = vst.msk [vmem:[%s1721_s22 + $0x28] sm:$0xf] %vm1105_vm4, %v1368_v63  ;;  %v1385_v9 = vpack.c.bf16 %v972_v3, %v972_v3  ;;  %v941_v19 = vadd.f32 %v1707_v2, %v902_v15  ;;  %v821_v20 = vadd.f32 %v738_v16, %v320_v6  ;;  %v837_v21 = vadd.f32 %v802_v17, %v336_v7 }
 0x13f   : > { %1132 = vst.msk [vmem:[%s1721_s22 + $0x68] sm:$0xf] %vm1105_vm4, %v1384_v0  ;;  %1117 = vst.msk [vmem:[%s1721_s22 + $0x2c] sm:$0xf] %vm1105_vm4, %v1369_v8  ;;  %v957_v26 = vmax.f32 %v925_v18, 0.0 }
 0x140   : > { %1133 = vst.msk [vmem:[%s1721_s22 + $0x6c] sm:$0xf] %vm1105_vm4, %v1385_v9  ;;  %v887_v24 = vld [vmem:[#allocation2 + $0x68] sm:$0xff]  ;;  %v973_v27 = vmax.f32 %v941_v19, 0.0 }
 0x141   : > { %v903_v25 = vld [vmem:[#allocation2 + $0xe8] sm:$0xff]  ;;  %v926_v28 = vadd.f32 %v1707_v2, %v887_v24  ;;  %854 = vst.msk [vmem:[#allocation2 + $0x78] sm:$0xff] %vm272_vm0, %v821_v20  ;;  %870 = vst.msk [vmem:[#allocation2 + $0xf8] sm:$0xff] %vm272_vm0, %v837_v21  ;;  %v1370_v30 = vpack.c.bf16 %v957_v26, %v957_v26 }
 0x142   : > { %v942_v29 = vadd.f32 %v1707_v2, %v903_v25  ;;  %v1386_v31 = vpack.c.bf16 %v973_v27, %v973_v27 }
 0x143   : > { %v958_v32 = vmax.f32 %v926_v28, 0.0  ;;  %1118 = vst.msk [vmem:[%s1721_s22 + $0x30] sm:$0xf] %vm1105_vm4, %v1370_v30 }
 0x144   : > { %v974_v33 = vmax.f32 %v942_v29, 0.0  ;;  %1134 = vst.msk [vmem:[%s1721_s22 + $0x70] sm:$0xf] %vm1105_vm4, %v1386_v31  ;;  %v888_v36 = vld [vmem:[#allocation2 + $0x70] sm:$0xff] }
 0x145   : > { %v1371_v34 = vpack.c.bf16 %v958_v32, %v958_v32  ;;  %v904_v37 = vld [vmem:[#allocation2 + $0xf0] sm:$0xff]  ;;  %v927_v38 = vadd.f32 %v1707_v2, %v888_v36 }
 0x146   : > { %v1387_v35 = vpack.c.bf16 %v974_v33, %v974_v33  ;;  %v943_v39 = vadd.f32 %v1707_v2, %v904_v37 }
 0x147   : > { %1119 = vst.msk [vmem:[%s1721_s22 + $0x34] sm:$0xf] %vm1105_vm4, %v1371_v34  ;;  %v959_v42 = vmax.f32 %v927_v38, 0.0 }
 0x148   : > { %1135 = vst.msk [vmem:[%s1721_s22 + $0x74] sm:$0xf] %vm1105_vm4, %v1387_v35  ;;  %v889_v40 = vld [vmem:[#allocation2 + $0x78] sm:$0xff]  ;;  %v975_v43 = vmax.f32 %v943_v39, 0.0 }
 0x149   : > { %v905_v41 = vld [vmem:[#allocation2 + $0xf8] sm:$0xff]  ;;  %v928_v44 = vadd.f32 %v1707_v2, %v889_v40  ;;  %v1372_v46 = vpack.c.bf16 %v959_v42, %v959_v42 }
 0x14a   : > { %v944_v45 = vadd.f32 %v1707_v2, %v905_v41  ;;  %v1388_v47 = vpack.c.bf16 %v975_v43, %v975_v43 }
 0x14b   : > { %v960_v48 = vmax.f32 %v928_v44, 0.0  ;;  %1120 = vst.msk [vmem:[%s1721_s22 + $0x38] sm:$0xf] %vm1105_vm4, %v1372_v46 }
 0x14c   : > { %v976_v49 = vmax.f32 %v944_v45, 0.0  ;;  %1136 = vst.msk [vmem:[%s1721_s22 + $0x78] sm:$0xf] %vm1105_vm4, %v1388_v47 }
 0x14d   : > { %v1373_v50 = vpack.c.bf16 %v960_v48, %v960_v48 }
 0x14e   : > { %v1389_v51 = vpack.c.bf16 %v976_v49, %v976_v49 }
 0x14f   : > { %1121 = vst.msk [vmem:[%s1721_s22 + $0x3c] sm:$0xf] %vm1105_vm4, %v1373_v50 }
 0x150   : > { %1137 = vst.msk [vmem:[%s1721_s22 + $0x7c] sm:$0xf] %vm1105_vm4, %v1389_v51 }
 0x151 PF: > { %s13_s14 = sadd.s32 1, %s1517_s14   ;;  %s1852_s12 = smov %s1513_s13 }
 0x152   : > { %p10_p5 = scmp.ge.s32.totalorder %s13_s14, 4   ;;  %s1853_s13 = smov %s1855_s15 }
 0x154   :  { %12 = sbr.rel (!%p10_p5) target bundleno = 2 (0x2), region = 76 }

</bundles_post_ra>
